<compile_context>
chip_gen: v7x
topology: tpu7x:2x2x1
jax: 0.10.0
libtpu: 0.0.40
codegen_flags: <defaults>
</compile_context>

<pallas_src>
import jax
import jax.numpy as jnp
from jax import lax
from jax.experimental import pallas as pl
from jax.experimental.pallas import tpu as pltpu


def _attention_head_kernel(x_ref, wq_ref, wk_ref, wv_ref, wp_ref, bp_ref,
                           o_ref, acc_ref):
    """One (batch, head) grid step.

    x_ref   : (1, N, C)  tokens for this batch element
    wq/wk/wv: (1, C, D)  this head's projection weights (scale folded into wq)
    wp_ref  : (1, D, C)  this head's rows of the output projection
    bp_ref  : (1, C)     proj bias
    o_ref   : (1, N, C)  output block (written on the last head)
    acc_ref : (N, C) f32 scratch accumulator across heads
    """
    h = pl.program_id(1)
    num_heads = pl.num_programs(1)

    @pl.when(h == 0)
    def _():
        acc_ref[...] = jnp.zeros_like(acc_ref)

    x = x_ref[0]        # (N, C), input dtype
    wq = wq_ref[0]      # (C, D)
    wk = wk_ref[0]      # (C, D)
    wv = wv_ref[0]      # (C, D)
    wp = wp_ref[0]      # (D, C)

    # Per-head Q/K/V projections: MXU matmuls with f32 accumulation, results
    # kept in the input dtype so the downstream matmuls stay bf16-friendly.
    q = jnp.dot(x, wq, preferred_element_type=jnp.float32).astype(x.dtype)  # (N, D)
    k = jnp.dot(x, wk, preferred_element_type=jnp.float32).astype(x.dtype)  # (N, D)
    v = jnp.dot(x, wv, preferred_element_type=jnp.float32).astype(x.dtype)  # (N, D)

    # Scores: contract the last dims directly (no explicit k.T).
    s = lax.dot_general(q, k, dimension_numbers=(((1,), (1,)), ((), ())),
                        preferred_element_type=jnp.float32)                 # (N, N)

    # Numerically-stable softmax; divide via EUP approximate reciprocal.
    s = s - jnp.max(s, axis=-1, keepdims=True)
    e = jnp.exp(s)
    p = e * pl.reciprocal(jnp.sum(e, axis=-1, keepdims=True), approx=True)

    # attn @ v (f32 accumulation on the MXU).
    pv = jnp.dot(p.astype(x.dtype), v,
                 preferred_element_type=jnp.float32)                        # (N, D)

    # Fold this head's contribution straight into the output projection.
    acc_ref[...] += jnp.dot(pv.astype(wp.dtype), wp,
                            preferred_element_type=jnp.float32)             # (N, C)

    @pl.when(h == num_heads - 1)
    def _():
        o_ref[0] = (acc_ref[...] + bp_ref[0].astype(jnp.float32)).astype(o_ref.dtype)


def attention_with_cls(x, wq, wk, wv, wp, bp, *, num_heads):
    """x: (B, N, C); wq/wk/wv/wp: (C, C) stored as (in, out); bp: (C,)."""
    B, N, C = x.shape
    assert C % num_heads == 0, "dim should be divisible by num_heads"
    D = C // num_heads
    scale = D ** (-0.5)

    # Host-side re-layout into per-head weight blocks; fold scale into wq.
    wq_h = (wq * scale).reshape(C, num_heads, D).transpose(1, 0, 2)  # (H, C, D)
    wk_h = wk.reshape(C, num_heads, D).transpose(1, 0, 2)            # (H, C, D)
    wv_h = wv.reshape(C, num_heads, D).transpose(1, 0, 2)            # (H, C, D)
    wp_h = wp.reshape(num_heads, D, C)                               # (H, D, C)
    bp2d = bp.reshape(1, C)

    return pl.pallas_call(
        _attention_head_kernel,
        out_shape=jax.ShapeDtypeStruct((B, N, C), x.dtype),
        grid_spec=pltpu.PrefetchScalarGridSpec(
            num_scalar_prefetch=0,
            grid=(B, num_heads),
            in_specs=[
                pl.BlockSpec((1, N, C), lambda b, h: (b, 0, 0)),   # x (revisited per head)
                pl.BlockSpec((1, C, D), lambda b, h: (h, 0, 0)),   # wq (pre-scaled)
                pl.BlockSpec((1, C, D), lambda b, h: (h, 0, 0)),   # wk
                pl.BlockSpec((1, C, D), lambda b, h: (h, 0, 0)),   # wv
                pl.BlockSpec((1, D, C), lambda b, h: (h, 0, 0)),   # wp (per-head rows)
                pl.BlockSpec((1, C), lambda b, h: (0, 0)),         # proj bias
            ],
            out_specs=pl.BlockSpec((1, N, C), lambda b, h: (b, 0, 0)),
            scratch_shapes=[pltpu.VMEM((N, C), jnp.float32)],
        ),
        compiler_params=pltpu.CompilerParams(
            dimension_semantics=("parallel", "arbitrary")),
    )(x, wq_h, wk_h, wv_h, wp_h, bp2d)


def _reference(x, wq, wk, wv, wp, bp, *, num_heads):
    """Pure-JAX reference mirroring the PyTorch forward exactly."""
    B, N, C = x.shape
    D = C // num_heads
    scale = D ** (-0.5)
    q = (x @ wq).reshape(B, N, num_heads, D).transpose(0, 2, 1, 3)
    k = (x @ wk).reshape(B, N, num_heads, D).transpose(0, 2, 1, 3)
    v = (x @ wv).reshape(B, N, num_heads, D).transpose(0, 2, 1, 3)
    attn = jnp.einsum("bhnd,bhmd->bhnm", q, k) * scale
    attn = jax.nn.softmax(attn, axis=-1)
    out = jnp.einsum("bhnm,bhmd->bhnd", attn, v)
    out = out.transpose(0, 2, 1, 3).reshape(B, N, C)
    return out @ wp + bp


if __name__ == "__main__":
    # Small shapes consistent with the module: B=2, N=8 tokens, C=32 channels, 4 heads.
    B, N, C = 2, 8, 32
    num_heads = 4

    key = jax.random.PRNGKey(0)
    kx, kq, kk, kv, kp, kb = jax.random.split(key, 6)

    x = jax.random.normal(kx, (B, N, C), dtype=jnp.float32)
    wq = 0.02 * jax.random.normal(kq, (C, C), dtype=jnp.float32)
    wk = 0.02 * jax.random.normal(kk, (C, C), dtype=jnp.float32)
    wv = 0.02 * jax.random.normal(kv, (C, C), dtype=jnp.float32)
    wp = 0.02 * jax.random.normal(kp, (C, C), dtype=jnp.float32)
    bp = 0.02 * jax.random.normal(kb, (C,), dtype=jnp.float32)

    out = attention_with_cls(x, wq, wk, wv, wp, bp, num_heads=num_heads)
    out = jax.block_until_ready(out)

    ref = _reference(x, wq, wk, wv, wp, bp, num_heads=num_heads)
    assert out.shape == (B, N, C)
    # approx reciprocal in the softmax => slightly looser tolerance than exact f32
    assert jnp.allclose(out, ref, atol=2e-3, rtol=2e-3), "mismatch vs reference"

    print("KERNEL_OK")
</pallas_src>

<mosaic_0001>
module attributes {stable_mosaic.version = 11 : i64} {
  func.func @_attention_head_kernel(%arg0: i32, %arg1: i32, %arg2: memref<1x8x32xf32, #tpu.memory_space<vmem>>, %arg3: memref<1x32x8xf32, #tpu.memory_space<vmem>>, %arg4: memref<1x32x8xf32, #tpu.memory_space<vmem>>, %arg5: memref<1x32x8xf32, #tpu.memory_space<vmem>>, %arg6: memref<1x8x32xf32, #tpu.memory_space<vmem>>, %arg7: memref<1x32xf32, #tpu.memory_space<vmem>>, %arg8: memref<1x8x32xf32, #tpu.memory_space<vmem>>, %arg9: memref<8x32xf32, #tpu.memory_space<vmem>>) attributes {dimension_semantics = [#tpu.dimension_semantics<parallel>, #tpu.dimension_semantics<arbitrary>], iteration_bounds = array<i64: 2, 4>, scalar_prefetch = 0 : i64, scratch_operands = 1 : i64, tpu.core_type = #tpu.core_type<tc>, window_params = [{transform_indices = @transform_0, window_bounds = array<i64: 1, 8, 32>}, {transform_indices = @transform_1, window_bounds = array<i64: 1, 32, 8>}, {transform_indices = @transform_2, window_bounds = array<i64: 1, 32, 8>}, {transform_indices = @transform_3, window_bounds = array<i64: 1, 32, 8>}, {transform_indices = @transform_4, window_bounds = array<i64: 1, 8, 32>}, {pipeline_mode = #tpu.pipeline_mode<synchronous>, transform_indices = @transform_5, window_bounds = array<i64: 1, 32>}, {transform_indices = @transform_6, window_bounds = array<i64: 1, 8, 32>}]} {
    %c0_i32 = arith.constant 0 : i32
    %0 = arith.cmpi eq, %arg1, %c0_i32 : i32
    %1 = arith.extui %0 : i1 to i32
    %c0_i32_0 = arith.constant 0 : i32
    %2 = arith.cmpi ne, %1, %c0_i32_0 : i32
    scf.if %2 {
      %cst_27 = arith.constant 0.000000e+00 : f32
      %35 = vector.broadcast %cst_27 : f32 to vector<8x32xf32>
      %c0_28 = arith.constant 0 : index
      %c0_29 = arith.constant 0 : index
      %36 = vector.load %arg9[%c0_28, %c0_29] : memref<8x32xf32, #tpu.memory_space<vmem>>, vector<8x32xf32>
      tpu.vector_store %arg9[%c0_28, %c0_29], %35 {strides = array<i32>} : memref<8x32xf32, #tpu.memory_space<vmem>>, vector<8x32xf32>,
    } else {
    }
    %c0 = arith.constant 0 : index
    %c0_1 = arith.constant 0 : index
    %c0_2 = arith.constant 0 : index
    %3 = vector.load %arg2[%c0, %c0_1, %c0_2] : memref<1x8x32xf32, #tpu.memory_space<vmem>>, vector<1x8x32xf32>
    %4 = vector.shape_cast %3 : vector<1x8x32xf32> to vector<8x32xf32>
    %c0_3 = arith.constant 0 : index
    %c0_4 = arith.constant 0 : index
    %c0_5 = arith.constant 0 : index
    %5 = vector.load %arg3[%c0_3, %c0_4, %c0_5] : memref<1x32x8xf32, #tpu.memory_space<vmem>>, vector<1x32x8xf32>
    %6 = vector.shape_cast %5 : vector<1x32x8xf32> to vector<32x8xf32>
    %c0_6 = arith.constant 0 : index
    %c0_7 = arith.constant 0 : index
    %c0_8 = arith.constant 0 : index
    %7 = vector.load %arg4[%c0_6, %c0_7, %c0_8] : memref<1x32x8xf32, #tpu.memory_space<vmem>>, vector<1x32x8xf32>
    %8 = vector.shape_cast %7 : vector<1x32x8xf32> to vector<32x8xf32>
    %c0_9 = arith.constant 0 : index
    %c0_10 = arith.constant 0 : index
    %c0_11 = arith.constant 0 : index
    %9 = vector.load %arg5[%c0_9, %c0_10, %c0_11] : memref<1x32x8xf32, #tpu.memory_space<vmem>>, vector<1x32x8xf32>
    %10 = vector.shape_cast %9 : vector<1x32x8xf32> to vector<32x8xf32>
    %c0_12 = arith.constant 0 : index
    %c0_13 = arith.constant 0 : index
    %c0_14 = arith.constant 0 : index
    %11 = vector.load %arg6[%c0_12, %c0_13, %c0_14] : memref<1x8x32xf32, #tpu.memory_space<vmem>>, vector<1x8x32xf32>
    %12 = vector.shape_cast %11 : vector<1x8x32xf32> to vector<8x32xf32>
    %cst = arith.constant dense<0.000000e+00> : vector<8x8xf32>
    %13 = tpu.matmul %4, %6, %cst {dimension_numbers = #tpu.dot_dimension_numbers<[1], [0], [0], [1], [0, 0, 1, 1], [], []>} : vector<8x32xf32>, vector<32x8xf32>, vector<8x8xf32> -> vector<8x8xf32>
    %cst_15 = arith.constant dense<0.000000e+00> : vector<8x8xf32>
    %14 = tpu.matmul %4, %8, %cst_15 {dimension_numbers = #tpu.dot_dimension_numbers<[1], [0], [0], [1], [0, 0, 1, 1], [], []>} : vector<8x32xf32>, vector<32x8xf32>, vector<8x8xf32> -> vector<8x8xf32>
    %cst_16 = arith.constant dense<0.000000e+00> : vector<8x8xf32>
    %15 = tpu.matmul %4, %10, %cst_16 {dimension_numbers = #tpu.dot_dimension_numbers<[1], [0], [0], [1], [0, 0, 1, 1], [], []>} : vector<8x32xf32>, vector<32x8xf32>, vector<8x8xf32> -> vector<8x8xf32>
    %cst_17 = arith.constant dense<0.000000e+00> : vector<8x8xf32>
    %16 = tpu.matmul %13, %14, %cst_17 {dimension_numbers = #tpu.dot_dimension_numbers<[1], [1], [0], [0], [0, 0, 1, 0], [], []>} : vector<8x8xf32>, vector<8x8xf32>, vector<8x8xf32> -> vector<8x8xf32>
    %cst_18 = arith.constant dense<0xFF800000> : vector<8xf32>
    %17 = vector.multi_reduction <maximumf>, %16, %cst_18 [1] : vector<8x8xf32> to vector<8xf32>
    %18 = vector.shape_cast %17 : vector<8xf32> to vector<8x1xf32>
    %19 = vector.broadcast %18 : vector<8x1xf32> to vector<8x8xf32>
    %20 = arith.subf %16, %19 : vector<8x8xf32>
    %21 = math.exp %20 : vector<8x8xf32>
    %cst_19 = arith.constant dense<0.000000e+00> : vector<8xf32>
    %22 = vector.multi_reduction <add>, %21, %cst_19 [1] : vector<8x8xf32> to vector<8xf32>
    %23 = vector.shape_cast %22 : vector<8xf32> to vector<8x1xf32>
    %24 = tpu.reciprocal %23 {approx = true} : vector<8x1xf32> -> vector<8x1xf32>
    %25 = vector.broadcast %24 : vector<8x1xf32> to vector<8x8xf32>
    %26 = arith.mulf %21, %25 : vector<8x8xf32>
    %cst_20 = arith.constant dense<0.000000e+00> : vector<8x8xf32>
    %27 = tpu.matmul %26, %15, %cst_20 {dimension_numbers = #tpu.dot_dimension_numbers<[1], [0], [0], [1], [0, 0, 1, 1], [], []>} : vector<8x8xf32>, vector<8x8xf32>, vector<8x8xf32> -> vector<8x8xf32>
    %c0_21 = arith.constant 0 : index
    %c0_22 = arith.constant 0 : index
    %28 = vector.load %arg9[%c0_21, %c0_22] : memref<8x32xf32, #tpu.memory_space<vmem>>, vector<8x32xf32>
    %cst_23 = arith.constant dense<0.000000e+00> : vector<8x32xf32>
    %29 = tpu.matmul %27, %12, %cst_23 {dimension_numbers = #tpu.dot_dimension_numbers<[1], [0], [0], [1], [0, 0, 1, 1], [], []>} : vector<8x8xf32>, vector<8x32xf32>, vector<8x32xf32> -> vector<8x32xf32>
    %30 = arith.addf %28, %29 : vector<8x32xf32>
    %c0_24 = arith.constant 0 : index
    %c0_25 = arith.constant 0 : index
    %31 = vector.load %arg9[%c0_24, %c0_25] : memref<8x32xf32, #tpu.memory_space<vmem>>, vector<8x32xf32>
    tpu.vector_store %arg9[%c0_24, %c0_25], %30 {strides = array<i32>} : memref<8x32xf32, #tpu.memory_space<vmem>>, vector<8x32xf32>,
    %c3_i32 = arith.constant 3 : i32
    %32 = arith.cmpi eq, %arg1, %c3_i32 : i32
    %33 = arith.extui %32 : i1 to i32
    %c0_i32_26 = arith.constant 0 : i32
    %34 = arith.cmpi ne, %33, %c0_i32_26 : i32
    scf.if %34 {
      %c0_27 = arith.constant 0 : index
      %c0_28 = arith.constant 0 : index
      %35 = vector.load %arg9[%c0_27, %c0_28] : memref<8x32xf32, #tpu.memory_space<vmem>>, vector<8x32xf32>
      %c0_29 = arith.constant 0 : index
      %c0_30 = arith.constant 0 : index
      %36 = vector.load %arg7[%c0_29, %c0_30] : memref<1x32xf32, #tpu.memory_space<vmem>>, vector<1x32xf32>
      %37 = vector.shape_cast %36 : vector<1x32xf32> to vector<32xf32>
      %38 = vector.shape_cast %37 : vector<32xf32> to vector<1x32xf32>
      %39 = vector.broadcast %38 : vector<1x32xf32> to vector<8x32xf32>
      %40 = arith.addf %35, %39 : vector<8x32xf32>
      %c0_31 = arith.constant 0 : index
      %c0_32 = arith.constant 0 : index
      %c0_33 = arith.constant 0 : index
      %41 = vector.load %arg8[%c0_31, %c0_32, %c0_33] : memref<1x8x32xf32, #tpu.memory_space<vmem>>, vector<1x8x32xf32>
      %42 = vector.shape_cast %41 : vector<1x8x32xf32> to vector<8x32xf32>
      %43 = vector.shape_cast %40 : vector<8x32xf32> to vector<1x8x32xf32>
      tpu.vector_store %arg8[%c0_31, %c0_32, %c0_33], %43 {strides = array<i32>} : memref<1x8x32xf32, #tpu.memory_space<vmem>>, vector<1x8x32xf32>,
    } else {
    }
    return
  }
  func.func @transform_0(%arg0: i32, %arg1: i32) -> (i32, i32, i32) {
    %c0_i32 = arith.constant 0 : i32
    %c0_i32_0 = arith.constant 0 : i32
    %c0_i32_1 = arith.constant 0 : i32
    return %arg0, %c0_i32, %c0_i32_0 : i32, i32, i32
  }
  func.func @transform_1(%arg0: i32, %arg1: i32) -> (i32, i32, i32) {
    %c0_i32 = arith.constant 0 : i32
    %c0_i32_0 = arith.constant 0 : i32
    %c0_i32_1 = arith.constant 0 : i32
    return %arg1, %c0_i32, %c0_i32_0 : i32, i32, i32
  }
  func.func @transform_2(%arg0: i32, %arg1: i32) -> (i32, i32, i32) {
    %c0_i32 = arith.constant 0 : i32
    %c0_i32_0 = arith.constant 0 : i32
    %c0_i32_1 = arith.constant 0 : i32
    return %arg1, %c0_i32, %c0_i32_0 : i32, i32, i32
  }
  func.func @transform_3(%arg0: i32, %arg1: i32) -> (i32, i32, i32) {
    %c0_i32 = arith.constant 0 : i32
    %c0_i32_0 = arith.constant 0 : i32
    %c0_i32_1 = arith.constant 0 : i32
    return %arg1, %c0_i32, %c0_i32_0 : i32, i32, i32
  }
  func.func @transform_4(%arg0: i32, %arg1: i32) -> (i32, i32, i32) {
    %c0_i32 = arith.constant 0 : i32
    %c0_i32_0 = arith.constant 0 : i32
    %c0_i32_1 = arith.constant 0 : i32
    return %arg1, %c0_i32, %c0_i32_0 : i32, i32, i32
  }
  func.func @transform_5(%arg0: i32, %arg1: i32) -> (i32, i32) {
    %c0_i32 = arith.constant 0 : i32
    %c0_i32_0 = arith.constant 0 : i32
    %c0_i32_1 = arith.constant 0 : i32
    return %c0_i32, %c0_i32_0 : i32, i32
  }
  func.func @transform_6(%arg0: i32, %arg1: i32) -> (i32, i32, i32) {
    %c0_i32 = arith.constant 0 : i32
    %c0_i32_0 = arith.constant 0 : i32
    %c0_i32_1 = arith.constant 0 : i32
    return %arg0, %c0_i32, %c0_i32_0 : i32, i32, i32
  }
}

</mosaic_0001>

<bundles_post_ra>
// kernel: tpu_custom_call.1
= control target key start
LH: loop header
LB: loop body
LE: loop exit
PB: predicated region body
PF: predicated region fallthrough
CT: control target
= control target key end

     0   :  { %11 = vsyncpa [#allocation4], 0  ;;  %s1471_s0 = inlined_call_operand.vmem [shape: f32[2,8,32], index: 0, kind: input, shape index: {}]   ;;  %s1472_s1 = inlined_call_operand.vmem [shape: f32[4,32,8], index: 1, kind: input, shape index: {}]   ;;  %s1473_s2 = inlined_call_operand.vmem [shape: f32[4,32,8], index: 2, kind: input, shape index: {}]   ;;  %s1474_s3 = inlined_call_operand.vmem [shape: f32[4,32,8], index: 3, kind: input, shape index: {}]   ;;  %s1475_s4 = inlined_call_operand.vmem [shape: f32[4,8,32], index: 4, kind: input, shape index: {}]   ;;  %s1476_s5 = inlined_call_operand.vmem [shape: f32[1,32], index: 5, kind: input, shape index: {}]   ;;  %s1477_s6 = inlined_call_operand.hbm [shape: f32[2,8,32], index: 6, kind: output, shape index: {}]  }
   0x1   :  { %13 = vsyncpa [#allocation4 + $0x1], 0  ;;  %s1286_s21 = smov 0   ;;  %s1288_s22 = smov 0  }
   0x2   :  { %s1290_s23 = smov 0   ;;  %s1292_s24 = smov 0  }
   0x3   :  { %s1294_s25 = smov 0   ;;  %s1296_s26 = smov 0  }
   0x4   :  { %s1298_s27 = smov 0   ;;  %s1300_s28 = smov 0  }
   0x5 LB: > { %1485 = sst [smem:[#allocation6_spill]] %s1216_s21  ;;  %s953_s29 = sadd.s32 4294967295, %s1244_s28   ;;  %s1244_s28 = sphi %s1300_s28, %s19_s28   ;;  %s1240_s27 = sphi %s1298_s27, %s1503_s27   ;;  %s1236_s26 = sphi %s1296_s26, %s1506_s26   ;;  %s1232_s25 = sphi %s1294_s25, %s1501_s25   ;;  %s1228_s24 = sphi %s1292_s24, %s1500_s24   ;;  %s1224_s23 = sphi %s1290_s23, %s1499_s23   ;;  %s1220_s22 = sphi %s1288_s22, %s1505_s22   ;;  %s1216_s21 = sphi %s1286_s21, %s1504_s21  }
   0x6   : > { %1486 = sst [smem:[#allocation7_spill]] %s1224_s23  ;;  %s954_s30 = sadd.s32 4294967294, %s1244_s28  }
   0x7   : > { %1487 = sst [smem:[#allocation8_spill]] %s1236_s26  ;;  %s28_s7 = sadd.s32 1, %s1236_s26 }
   0x8   : > { %1488 = sst [smem:[#allocation9_spill]] %s1240_s27  ;;  %p29_p0 = scmp.ge.s32.totalorder %s28_s7, 4 }
   0x9   : > { %s31_s8 = sadd.s32 1, %s1240_s27  ;;  %p199_p1 = scmp.ne.s32.totalorder %s1224_s23, %s1220_s22 }
   0xa   : > { %p200_p2 = scmp.eq.s32.totalorder %s953_s29, 7  ;;  %s1508_s7 = smov (%p29_p0, %s28_s7), 0 }
   0xb   : > { %1489 = sst [smem:[#allocation10_spill]] %s1508_s7  ;;  %s1510_s8 = smov (!%p29_p0, %s31_s8), %s1240_s27 }
   0xc   : > { %p1335_p3 = por %p200_p2, %p199_p1  ;;  %p205_p4 = scmp.ne.s32.totalorder %s1220_s22, %s1216_s21 }
   0xd   : > { %p33_p5 = scmp.ge.s32.totalorder %s1510_s8, 2  ;;  %p206_p6 = scmp.eq.s32.totalorder %s954_s30, 7 }
   0xe   : > { %p957_p7 = scmp.ge.s32.totalorder %s1244_s28, 1  ;;  %p265_p8 = scmp.lt.s32.totalorder %s1244_s28, 9 }
   0xf   : > { %s1512_s8 = smov (%p33_p5, %s1510_s8), 0  ;;  %p1345_p9 = por %p206_p6, %p205_p4 }
  0x10   : > { %1491 = sst [smem:[#allocation11_spill]] %s1512_s8  ;;  %p266_p10 = pnand %p957_p7, %p265_p8 }
  0x11   : > { %s1492_s10 = scalar_select %p1345_p9, 1, 0 }
  0x12   : > { %s186_s11 = ssub.s32 %s1240_s27, %s1512_s8  ;;  %s189_s12 = sadd.s32 1, %s1224_s23 }
  0x13   : > { %1493 = sst [smem:[#allocation12_spill]] %s1492_s10  ;;  %p187_p11 = scmp.eq.s32.totalorder %s186_s11, 0 }
  0x14   : > { %269 = sbr.rel (%p266_p10) target bundleno = 1249 (0x4e1), region = 44  ;;  %s1480_s14 = sand.u32 (!%p266_p10), 1, %s1220_s22  }
  0x15   : > { %s1353_s13 = scalar_select %p187_p11, %s1224_s23, %s189_s12  }
  0x16   : > { %p313_p12 = scmp.lt.s32.totalorder (!%p266_p10), %s1232_s25, 1  ;;  %s1359_s15 = sshll.u32 (!%p266_p10), %s1480_s14, 3 }
  0x17   : > { %1494 = sst [smem:[#allocation13_spill]] %s1353_s13  ;;  %p317_p13 = scmp.lt.s32.totalorder (!%p266_p10), %s1228_s24, 3 }
  0x18   : > { %s312_s19 = scalar_lea.vmem (!%p266_p10), [#allocation3], %s1359_s15  ;;  %p967_p0 = scmp.ne.s32.totalorder (!%p266_p10), %s1228_s24, 0 }
  0x1b   : > { %s314_s16 = scalar_select %p313_p12, %s1232_s25, 1 }
  0x1c   : > { %s318_s17 = scalar_select %p317_p13, %s1228_s24, 3 }
  0x1d   : > { %s959_s18 = sshll.u32 %s314_s16, 3  ;;  %339 = sbr.rel (%p967_p0) target bundleno = 36 (0x24), region = 48  ;;  %vm340_vm0 = vcmask (!%p967_p0), 261120   ;;  %v1246_v0 = vmov (!%p967_p0), 0.0  }
  0x1e   : > { %s1367_s29 = scalar_lea.vmem %s1471_s0, %s959_s18  ;;  %s981_s30 = sshll.u32 %s318_s17, 5  ;;  %341 = vst.msk [vmem:[#allocation2] sm:$0xff] (!%p967_p0), %vm340_vm0, %v1246_v0 }
  0x1f   : > { %s321_s8 = scalar_lea.vmem %s1472_s1, %s981_s30  ;;  %s326_s14 = scalar_lea.vmem %s1473_s2, %s981_s30 }
  0x20   : > { %s1378_s23 = scalar_lea.vmem %s1474_s3, %s981_s30  ;;  %s966_s16 = sshll.u32 %s318_s17, 3 }
  0x21   : > { %s1383_s18 = scalar_lea.vmem %s1475_s4, %s966_s16 }
  0x24 PF: > { %v347_v1 = vld [vmem:[%s326_s14] sm:$0xff]  ;;  %v348_v2 = vld [vmem:[%s326_s14 + $0x8] sm:$0xff]  ;;  %v1247_v4 = vmov 0.0|0.0   ;;  %v349_v7 = vld [vmem:[%s326_s14 + $0x10] sm:$0xff]  ;;  %vm1248_vm1 = vmmov 0   ;;  %v1249_v10 = vmov 0.0  }
  0x25   : > { %v343_v3 = vld [vmem:[%s321_s8] sm:$0xff]  ;;  %1059 = vmatprep.subr.bf16.mxu1 %v1247_v4  ;;  %v1060_v5 = vpack.c.bf16 %v348_v2, %v347_v1  ;;  %1053 = vmatprep.subr.bf16.mxu0 %v1247_v4  ;;  %v344_v6 = vld [vmem:[%s321_s8 + $0x8] sm:$0xff]  ;;  %v350_v8 = vld [vmem:[%s326_s14 + $0x18] sm:$0xff]  ;;  %vm356_vm2 = vcmask 261120   ;;  %vm570_vm3 = vcmask 64512   ;;  %p975_p1 = scmp.ne.s32.totalorder %s1228_s24, 3 }
  0x26   : > { %v1054_v9 = vpack.c.bf16 %v344_v6, %v343_v3  ;;  %1024 = vmatprep.mubr.msk.f32.mxu1 %vm1248_vm1, %v1249_v10  ;;  %v345_v11 = vld [vmem:[%s321_s8 + $0x10] sm:$0xff]  ;;  %v346_v12 = vld [vmem:[%s321_s8 + $0x18] sm:$0xff]  ;;  %1013 = vmatprep.mubr.msk.f32.mxu0 %vm1248_vm1, %v1249_v10  ;;  %v1063_v13 = vpack.c.bf16 %v350_v8, %v349_v7  ;;  %v342_v15 = vld [vmem:[%s1367_s29] sm:$0xff] }
  0x27   : > { %1061 = vmatpush3.bf16.msra.mxu1 %v1060_v5  ;;  %v1057_v14 = vpack.c.bf16 %v346_v12, %v345_v11  ;;  %v351_v20 = vld [vmem:[%s1378_s23] sm:$0xff]  ;;  %v352_v21 = vld [vmem:[%s1378_s23 + $0x8] sm:$0xff]  ;;  %v353_v22 = vld [vmem:[%s1378_s23 + $0x10] sm:$0xff] }
  0x28   : > { %1055 = vmatpush3.bf16.msra.mxu0 %v1054_v9  ;;  %1062 = vmatprep.subr.bf16.mxu1 %v1247_v4  ;;  %v1066_v23 = vpack.c.bf16 %v352_v21, %v351_v20  ;;  %v354_v24 = vld [vmem:[%s1378_s23 + $0x18] sm:$0xff]  ;;  %v355_v36 = vld [vmem:[%s1383_s18] sm:$0xff] }
  0x29   : > { %1056 = vmatprep.subr.bf16.mxu0 %v1247_v4  ;;  %v1069_v25 = vpack.c.bf16 %v354_v24, %v353_v22  ;;  %v731_v42 = vld [vmem:[#allocation2] sm:$0xff] }
  0x2a   : > { %v976_v47 = vld [vmem:[%s1476_s5] ss:$0 sm:$0xff] (!%p975_p1) }
  0x2b   : > { %1064 = vmatpush3.bf16.msra.mxu1 %v1063_v13 }
  0x2c   : > { %1058 = vmatpush3.bf16.msra.mxu0 %v1057_v14  ;;  %1038 = vmatprep.subr.mxu1 %v1249_v10 }
  0x2d   : > { %1065 = vmatprep.subr.bf16.mxu0 %v1247_v4 }
  0x2e   : > { %1025 = vmatmul.mubr.msk.f32.vlgmr.msra.gmra.mrb[0].mxu1 %vm356_vm2, %v342_v15 }
  0x2f   : > { %1014 = vmatmul.mubr.msk.f32.vlgmr.msra.gmra.mrb[0].mxu0 %vm356_vm2, %v342_v15  ;;  %1040 = vmatprep.mubr.msk.f32.mxu1 %vm1248_vm1, %v1249_v10 }
  0x30   : > { %1035 = vmatprep.mubr.msk.f32.mxu0 %vm1248_vm1, %v1249_v10  ;;  %1067 = vmatpush3.bf16.msra.mxu0 %v1066_v23 }
  0x31   : > { %1068 = vmatprep.subr.bf16.mxu0 %v1247_v4 }
  0x34   : > { %1070 = vmatpush3.bf16.msra.mxu0 %v1069_v25 }
  0x35   : > { %1048 = vmatprep.subr.mxu0 %v1249_v10 }
  0x37   : > { %1036 = vmatmul.mubr.msk.f32.vlgmr.msra.gmra.mrb[2].mxu0 %vm356_vm2, %v342_v15 }
  0x38   : > { %1050 = vmatprep.mubr.msk.f32.mxu0 %vm1248_vm1, %v1249_v10  ;;  %1049 = vmatpush3.msra.mxu0 %v355_v36 }
 0x101   : > { %v496_v16 = vpop.f32.mrb[0].mxu1 }
 0x102   : > { %v1026_v17 = vpop.f32.mrb[1].mxu1  ;;  %1039 = vmatpush3.xpose.msk.msra.mxu1 %vm570_vm3, %v496_v16  ;;  %v426_v18 = vpop.f32.mrb[0].mxu0 }
 0x103   : > { %v1015_v19 = vpop.f32.mrb[1].mxu0  ;;  %1043 = vmatprep.subr.mxu1 %v1249_v10 }
 0x105   : > { %1041 = vmatmul.mubr.msk.f32.vlgmr.msra.gmra.mrb[2].mxu1 %vm570_vm3, %v426_v18 }
 0x106   : > { %1045 = vmatprep.mubr.msk.f32.mxu1 %vm1248_vm1, %v1249_v10 }
 0x10a   : > { %v566_v34 = vpop.f32.mrb[2].mxu0 }
 0x10b   : > { %v1037_v35 = vpop.f32.mrb[3].mxu0  ;;  %1044 = vmatpush3.msra.mxu1 %v566_v34 }
 0x1d8   : > { %v643_v26 = vpop.f32.mrb[2].mxu1 }
 0x1d9   : > { %v1042_v27 = vpop.f32.mrb[3].mxu1  ;;  %v647_v28 = vsel %vm570_vm3, %v643_v26, -inf }
 0x1da   : > { %648 = vmax.xlane.f32.xlu0 %v647_v28 }
 0x267   : > { %v649_v29 = vpop.xlane.xlu0 %648 }
 0x268   : > { %v650_v30 = vsub.f32 %v643_v26, %v649_v29 }
 0x26a   : > { %v651_v31 = vmul.f32 1.442695, %v650_v30 }
 0x26c   : > { %1146 = vpow2.f32 %v651_v31 }
 0x276   : > { %v1147_v32 = vpop.eup %1146 }
 0x277   : > { %v653_v33 = vsel %vm570_vm3, %v1147_v32, 0.0 }
 0x278   : > { %654 = vadd.xlane.f32.xlu0 %v653_v33 }
 0x305   : > { %v655_v37 = vpop.xlane.xlu0 %654 }
 0x306   : > { %1148 = vrcp.f32 %v655_v37 }
 0x310   : > { %v1149_v38 = vpop.eup %1148 }
 0x311   : > { %v657_v39 = vmul.f32 %v1149_v38, %v1147_v32 }
 0x313   : > { %1046 = vmatmul.mubr.msk.f32.vlgmr.msra.gmra.mrb[4].mxu1 %vm570_vm3, %v657_v39 }
 0x3e6   : > { %v727_v40 = vpop.f32.mrb[4].mxu1 }
 0x3e7   : > { %v1047_v41 = vpop.f32.mrb[5].mxu1  ;;  %1051 = vmatmul.mubr.msk.f32.vlgmr.msra.gmra.mrb[4].mxu0 %vm570_vm3, %v727_v40 }
 0x4b7   : > { %810 = sbr.rel (%p975_p1) target bundleno = 1224 (0x4c8), region = 52 }
 0x4ba   : > { %v801_v43 = vpop.f32.mrb[4].mxu0 }
 0x4bb   : > { %v805_v44 = vadd.f32 %v801_v43, %v731_v42  ;;  %v1052_v45 = vpop.f32.mrb[5].mxu0 }
 0x4bd   : > { %806 = vst.msk [vmem:[#allocation2] sm:$0xff] %vm356_vm2, %v805_v44 }
 0x4c4   : > { %v811_v46 = vld [vmem:[#allocation2] sm:$0xff] }
 0x4c5   : > { %v819_v48 = vadd.f32 %v976_v47, %v811_v46 }
 0x4c7   : > { %820 = vst.msk [vmem:[%s312_s19] sm:$0xff] %vm356_vm2, %v819_v48 }
 0x4c8 PF: > { %s978_s26 = sshll.u32 %s1232_s25, 7  ;;  %s835_s8 = sshll.u32 %s312_s19, 4  ;;  %s836_s8 = int_to_ptr.vmem [resolvable:$true] %s835_s8 }
 0x4c9   : > { %s1420_s24 = scalar_lea.hbm %s1477_s6, %s978_s26  ;;  %s1495_s10 = sand.u32 1, %s1220_s22  }
 0x4ca   : > { %s822_s13 = scalar_lea.sflag [#allocation4], %s1495_s10  ;;  %s1150_s14 = scalar_lea.vmem %s836_s8, 128 }
 0x4cb   : > { %p1151_p2 = scmp.ne.s32.totalorder %s836_s8, %s1150_s14  ;;  %s1250_s17 = smov [#allocation3]  }
 0x4cc   : > { %s1154_s20 = sshll.u32 %s1250_s17, 4  ;;  %s1155_s20 = int_to_ptr.vmem [resolvable:$false] %s1154_s20 }
 0x4cd   : > { %p1152_p4 = pnand %p1151_p2, %p1335_p3  ;;  %s1156_s29 = scalar_lea.vmem %s1155_s20, 256 }
 0x4ce   : > { %p1157_p6 = scmp.lt.s32.totalorder %s836_s8, %s1155_s20  ;;  %p1158_p7 = scmp.lt.s32.totalorder %s1156_s29, %s1150_s14 }
 0x4cf   : > { %p1153_p5 = pneg %p1152_p4 }
 0x4d0   : > { %p1159_p8 = por %p1158_p7, %p1157_p6 }
 0x4d2   : > { %p1160_p10 = pnand %p1159_p8, %p1153_p5 }
 0x4d4   : > { %1163 = shalt.err (!%p1160_p10)
}
 0x4d5   : > { %s1164_s25 = scalar_lea.hbm %s1420_s24, 128  ;;  %s1168_s11 = scalar_lea.hbm %s1477_s6, 256 }
 0x4d6   : > { %p1165_p11 = scmp.ne.s32.totalorder %s1420_s24, %s1164_s25  ;;  %p1169_p0 = scmp.lt.u32.totalorder %s1420_s24, %s1477_s6 }
 0x4d7   : > { %p1170_p1 = scmp.lt.u32.totalorder %s1168_s11, %s1164_s25  ;;  %p1172_p4 = scmp.lt.u32.totalorder %s1164_s25, %s1420_s24 }
 0x4d8   : > { %p1166_p12 = pnand %p1165_p11, %p1335_p3 }
 0x4d9   : > { %p1171_p2 = por %p1170_p1, %p1169_p0 }
 0x4da   : > { %p1167_p13 = pneg %p1166_p12 }
 0x4db   : > { %p1173_p5 = por %p1172_p4, %p1171_p2 }
 0x4dd   : > { %p1174_p6 = pnand %p1173_p5, %p1167_p13 }
 0x4df   : > { %1177 = shalt.err (!%p1174_p6)
}
 0x4e0   : > { %1071 = dma.vmem_to_hbm [thread:$0]  (%p1335_p3), %s836_s8, 128, %s1420_s24, %s822_s13  }
 0x4e1 PF: > { %s1496_s18 = sld [smem:[#allocation6_spill]]  ;;  %p1077_p7 = scmp.ge.s32.totalorder %s1244_s28, 2 }
 0x4e3   : > { %p1074_p8 = pnand %p1077_p7, %p1345_p9 }
 0x4e7   : > { %s847_s21 = sand.u32 1, %s1496_s18  }
 0x4e8   : > { %s848_s23 = scalar_lea.sflag [#allocation4], %s847_s21 }
 0x4e9   : > { %1211 = dma.done.wait (!%p1074_p8), %s848_s23, 128  }
 0x4ea   : > { %1213 = vsyncadd (!%p1074_p8), %s848_s23, 4294967168  ;;  %s19_s28 = sadd.s32 1, %s1244_s28   ;;  %s1498_s26 = sld [smem:[#allocation7_spill]] }
 0x4eb   : > { %p16_p10 = scmp.ge.s32.totalorder %s19_s28, 10   ;;  %s1499_s23 = sld [smem:[#allocation13_spill]] }
 0x4ec   : > { %s1500_s24 = sld [smem:[#allocation8_spill]]  ;;  %s1501_s25 = sld [smem:[#allocation9_spill]] }
 0x4ed   : > { %s1502_s9 = sld [smem:[#allocation10_spill]]  ;;  %s1503_s27 = sld [smem:[#allocation11_spill]] }
 0x4ee   : > { %s1504_s21 = smov %s1220_s22  ;;  %18 = sbr.rel (!%p16_p10) target bundleno = 5 (0x5), region = 99 }
 0x4f0   : > { %s1505_s22 = smov %s1498_s26 }
 0x4f3   : > { %s1506_s26 = smov %s1502_s9 }
 0x4f5   :  { %853 = vsyncpa [#allocation4], 1 }
 0x4f6   :  { %855 = vsyncpa [#allocation4 + $0x1], 1 }

</bundles_post_ra>
